<compile_context>
chip_gen: v7x
topology: tpu7x:2x2x1
jax: 0.10.0
libtpu: 0.0.40
codegen_flags: <defaults>
</compile_context>

<pallas_src>
import jax
import jax.numpy as jnp
from jax import lax
from jax.experimental import pallas as pl
from jax.experimental.pallas import tpu as pltpu


def _round_up(x, m):
    return ((x + m - 1) // m) * m


def mlp_kernel(x_ref, w1_ref, b1_ref, w2_ref, b2_ref, out_ref):
    """One batch tile: linear -> tanh -> linear -> log_softmax.

    x_ref  : (TB, 784) bf16  batch tile (streamed narrow from HBM)
    w1_ref : (784, 20) bf16  (stored pre-transposed vs PyTorch's (20, 784))
    b1_ref : (1, 20)   f32
    w2_ref : (20, 10)  bf16
    b2_ref : (1, 10)   f32
    out_ref: (TB, 10)  f32   log-probabilities
    """
    x = x_ref[...]  # bf16

    # Layer 1: Linear(784 -> 20) + Tanh — bf16 operands, f32 MXU accumulation.
    h = jnp.dot(x, w1_ref[...], preferred_element_type=jnp.float32) + b1_ref[...]
    h = jnp.tanh(h)

    # Layer 2: Linear(20 -> 10) — cast activations to bf16, accumulate in f32.
    logits = (
        jnp.dot(h.astype(jnp.bfloat16), w2_ref[...],
                preferred_element_type=jnp.float32)
        + b2_ref[...]
    )

    # LogSoftmax(dim=1), numerically stable (max-shifted).
    m = jnp.max(logits, axis=1, keepdims=True)
    shifted = logits - m
    lse = jnp.log(jnp.sum(jnp.exp(shifted), axis=1, keepdims=True))
    out_ref[...] = shifted - lse


def mlp_forward(x_nchw, w1_t, b1_2d, w2_t, b2_2d, *, block_b=2048):
    """Flatten NCHW input and run the batch-tiled Pallas kernel.

    x_nchw : (B, 1, 28, 28) f32
    w1_t   : (784, 20)      pre-transposed layer-1 weight (f32 params)
    b1_2d  : (1, 20)
    w2_t   : (20, 10)       pre-transposed layer-2 weight (f32 params)
    b2_2d  : (1, 10)
    returns: (B, 10) log-probabilities (f32)
    """
    B = x_nchw.shape[0]

    # Narrow the dominant HBM stream: ship x (and the tiny weights) as bf16.
    # The unavoidable cast is the only pre-kernel pass over x (no jnp.pad copy).
    x2d = x_nchw.reshape(B, 1 * 28 * 28).astype(jnp.bfloat16)
    w1b = w1_t.astype(jnp.bfloat16)
    w2b = w2_t.astype(jnp.bfloat16)
    b1 = b1_2d.astype(jnp.float32)
    b2 = b2_2d.astype(jnp.float32)

    # Tile selection: split B as evenly as possible into the minimum number of
    # tiles of at most block_b rows; for large batches force >=2 grid steps so
    # both v7x TensorCores get work. Tiles are rounded to the bf16 sublane tile
    # (16 rows). Ragged tails are handled by Pallas' edge-block masking, so no
    # padding copy and at most tb-1 wasted rows in the last block.
    nsteps = pl.cdiv(B, block_b)
    if B >= 512:
        nsteps = max(nsteps, 2)
    tb = _round_up(pl.cdiv(B, nsteps), 16)
    grid = (pl.cdiv(B, tb),)

    return pl.pallas_call(
        mlp_kernel,
        out_shape=jax.ShapeDtypeStruct((B, 10), jnp.float32),
        grid_spec=pltpu.PrefetchScalarGridSpec(
            num_scalar_prefetch=0,
            grid=grid,
            in_specs=[
                # x: tiled along batch -> double-buffered, DMA overlaps compute.
                pl.BlockSpec((tb, 784), lambda i: (i, 0)),
                # Weights / biases: constant block index -> resident across steps.
                pl.BlockSpec((784, 20), lambda i: (0, 0)),
                pl.BlockSpec((1, 20), lambda i: (0, 0)),
                pl.BlockSpec((20, 10), lambda i: (0, 0)),
                pl.BlockSpec((1, 10), lambda i: (0, 0)),
            ],
            out_specs=pl.BlockSpec((tb, 10), lambda i: (i, 0)),
        ),
        compiler_params=pltpu.CompilerParams(
            # Batch tiles are independent: lets v7x shard the grid across its two
            # TensorCores (gain = overlapped per-step overhead + MXU/EUP work,
            # since HBM bandwidth is chip-shared); near-zero cost on v5e/v6e.
            dimension_semantics=("parallel",),
        ),
    )(x2d, w1b, b1, w2b, b2)


def init_params(key):
    """PyTorch-style nn.Linear init (uniform in [-1/sqrt(fan_in), 1/sqrt(fan_in)]),
    stored directly in the kernel's (in, out) layout so no per-call transposes."""
    k1, k2, k3, k4 = jax.random.split(key, 4)
    bound1 = 1.0 / jnp.sqrt(784.0)
    bound2 = 1.0 / jnp.sqrt(20.0)
    w1_t = jax.random.uniform(k1, (784, 20), jnp.float32, -bound1, bound1)
    b1 = jax.random.uniform(k2, (1, 20), jnp.float32, -bound1, bound1)
    w2_t = jax.random.uniform(k3, (20, 10), jnp.float32, -bound2, bound2)
    b2 = jax.random.uniform(k4, (1, 10), jnp.float32, -bound2, bound2)
    return w1_t, b1, w2_t, b2


if __name__ == "__main__":
    key = jax.random.PRNGKey(0)
    k_params, k_x = jax.random.split(key)

    w1_t, b1, w2_t, b2 = init_params(k_params)

    # Small MNIST-shaped batch (NCHW like PyTorch). Batch deliberately NOT a
    # multiple of the tile size to exercise the ragged edge-block path.
    B = 13
    x = jax.random.normal(k_x, (B, 1, 28, 28), jnp.float32)

    out = jax.block_until_ready(mlp_forward(x, w1_t, b1, w2_t, b2))

    # Pure-JAX f32 reference (highest matmul precision). The kernel streams bf16
    # inputs, so expect ~1e-3-scale deviations in the log-probs.
    x2d = x.reshape(B, 784)
    h_ref = jnp.tanh(jnp.dot(x2d, w1_t, precision=lax.Precision.HIGHEST) + b1)
    logits_ref = jnp.dot(h_ref, w2_t, precision=lax.Precision.HIGHEST) + b2
    ref = jax.nn.log_softmax(logits_ref, axis=1)

    assert out.shape == (B, 10)
    assert bool(jnp.all(jnp.isfinite(out))), "non-finite output"
    assert bool(jnp.allclose(out, ref, atol=3e-2, rtol=0.0)), "mismatch vs reference"

    print("KERNEL_OK")
</pallas_src>

<mosaic_0001>
module attributes {stable_mosaic.version = 11 : i64} {
  func.func @mlp_kernel(%arg0: i32, %arg1: memref<16x784xbf16, #tpu.memory_space<vmem>>, %arg2: memref<784x20xbf16, #tpu.memory_space<vmem>>, %arg3: memref<1x20xf32, #tpu.memory_space<vmem>>, %arg4: memref<20x10xbf16, #tpu.memory_space<vmem>>, %arg5: memref<1x10xf32, #tpu.memory_space<vmem>>, %arg6: memref<16x10xf32, #tpu.memory_space<vmem>>) attributes {dimension_semantics = [#tpu.dimension_semantics<parallel>], iteration_bounds = array<i64: 1>, scalar_prefetch = 0 : i64, scratch_operands = 0 : i64, tpu.core_type = #tpu.core_type<tc>, window_params = [{transform_indices = @transform_0, window_bounds = array<i64: 16, 784>}, {pipeline_mode = #tpu.pipeline_mode<synchronous>, transform_indices = @transform_1, window_bounds = array<i64: 784, 20>}, {pipeline_mode = #tpu.pipeline_mode<synchronous>, transform_indices = @transform_2, window_bounds = array<i64: 1, 20>}, {pipeline_mode = #tpu.pipeline_mode<synchronous>, transform_indices = @transform_3, window_bounds = array<i64: 20, 10>}, {pipeline_mode = #tpu.pipeline_mode<synchronous>, transform_indices = @transform_4, window_bounds = array<i64: 1, 10>}, {transform_indices = @transform_5, window_bounds = array<i64: 16, 10>}]} {
    %c0 = arith.constant 0 : index
    %c0_0 = arith.constant 0 : index
    %0 = vector.load %arg1[%c0, %c0_0] : memref<16x784xbf16, #tpu.memory_space<vmem>>, vector<16x784xbf16>
    %c0_1 = arith.constant 0 : index
    %c0_2 = arith.constant 0 : index
    %1 = vector.load %arg2[%c0_1, %c0_2] : memref<784x20xbf16, #tpu.memory_space<vmem>>, vector<784x20xbf16>
    %cst = arith.constant dense<0.000000e+00> : vector<16x20xf32>
    %2 = tpu.matmul %0, %1, %cst {dimension_numbers = #tpu.dot_dimension_numbers<[1], [0], [0], [1], [0, 0, 1, 1], [], []>} : vector<16x784xbf16>, vector<784x20xbf16>, vector<16x20xf32> -> vector<16x20xf32>
    %c0_3 = arith.constant 0 : index
    %c0_4 = arith.constant 0 : index
    %3 = vector.load %arg3[%c0_3, %c0_4] : memref<1x20xf32, #tpu.memory_space<vmem>>, vector<1x20xf32>
    %4 = vector.broadcast %3 : vector<1x20xf32> to vector<16x20xf32>
    %5 = arith.addf %2, %4 : vector<16x20xf32>
    %6 = math.tanh %5 : vector<16x20xf32>
    %7 = arith.truncf %6 : vector<16x20xf32> to vector<16x20xbf16>
    %c0_5 = arith.constant 0 : index
    %c0_6 = arith.constant 0 : index
    %8 = vector.load %arg4[%c0_5, %c0_6] : memref<20x10xbf16, #tpu.memory_space<vmem>>, vector<20x10xbf16>
    %cst_7 = arith.constant dense<0.000000e+00> : vector<16x10xf32>
    %9 = tpu.matmul %7, %8, %cst_7 {dimension_numbers = #tpu.dot_dimension_numbers<[1], [0], [0], [1], [0, 0, 1, 1], [], []>} : vector<16x20xbf16>, vector<20x10xbf16>, vector<16x10xf32> -> vector<16x10xf32>
    %c0_8 = arith.constant 0 : index
    %c0_9 = arith.constant 0 : index
    %10 = vector.load %arg5[%c0_8, %c0_9] : memref<1x10xf32, #tpu.memory_space<vmem>>, vector<1x10xf32>
    %11 = vector.broadcast %10 : vector<1x10xf32> to vector<16x10xf32>
    %12 = arith.addf %9, %11 : vector<16x10xf32>
    %cst_10 = arith.constant dense<0xFF800000> : vector<16xf32>
    %13 = vector.multi_reduction <maximumf>, %12, %cst_10 [1] : vector<16x10xf32> to vector<16xf32>
    %14 = vector.shape_cast %13 : vector<16xf32> to vector<16x1xf32>
    %15 = vector.broadcast %14 : vector<16x1xf32> to vector<16x10xf32>
    %16 = arith.subf %12, %15 : vector<16x10xf32>
    %17 = math.exp %16 : vector<16x10xf32>
    %cst_11 = arith.constant dense<0.000000e+00> : vector<16xf32>
    %18 = vector.multi_reduction <add>, %17, %cst_11 [1] : vector<16x10xf32> to vector<16xf32>
    %19 = vector.shape_cast %18 : vector<16xf32> to vector<16x1xf32>
    %20 = math.log %19 : vector<16x1xf32>
    %21 = vector.broadcast %20 : vector<16x1xf32> to vector<16x10xf32>
    %22 = arith.subf %16, %21 : vector<16x10xf32>
    %c0_12 = arith.constant 0 : index
    %c0_13 = arith.constant 0 : index
    %23 = vector.load %arg6[%c0_12, %c0_13] : memref<16x10xf32, #tpu.memory_space<vmem>>, vector<16x10xf32>
    tpu.vector_store %arg6[%c0_12, %c0_13], %22 {strides = array<i32>} : memref<16x10xf32, #tpu.memory_space<vmem>>, vector<16x10xf32>,
    return
  }
  func.func @transform_0(%arg0: i32) -> (i32, i32) {
    %c0_i32 = arith.constant 0 : i32
    %c0_i32_0 = arith.constant 0 : i32
    return %arg0, %c0_i32 : i32, i32
  }
  func.func @transform_1(%arg0: i32) -> (i32, i32) {
    %c0_i32 = arith.constant 0 : i32
    %c0_i32_0 = arith.constant 0 : i32
    %c0_i32_1 = arith.constant 0 : i32
    return %c0_i32, %c0_i32_0 : i32, i32
  }
  func.func @transform_2(%arg0: i32) -> (i32, i32) {
    %c0_i32 = arith.constant 0 : i32
    %c0_i32_0 = arith.constant 0 : i32
    %c0_i32_1 = arith.constant 0 : i32
    return %c0_i32, %c0_i32_0 : i32, i32
  }
  func.func @transform_3(%arg0: i32) -> (i32, i32) {
    %c0_i32 = arith.constant 0 : i32
    %c0_i32_0 = arith.constant 0 : i32
    %c0_i32_1 = arith.constant 0 : i32
    return %c0_i32, %c0_i32_0 : i32, i32
  }
  func.func @transform_4(%arg0: i32) -> (i32, i32) {
    %c0_i32 = arith.constant 0 : i32
    %c0_i32_0 = arith.constant 0 : i32
    %c0_i32_1 = arith.constant 0 : i32
    return %c0_i32, %c0_i32_0 : i32, i32
  }
  func.func @transform_5(%arg0: i32) -> (i32, i32) {
    %c0_i32 = arith.constant 0 : i32
    %c0_i32_0 = arith.constant 0 : i32
    return %arg0, %c0_i32 : i32, i32
  }
}

</mosaic_0001>

<bundles_post_ra>
// kernel: tpu_custom_call.1
= control target key start
LH: loop header
LB: loop body
LE: loop exit
PB: predicated region body
PF: predicated region fallthrough
CT: control target
= control target key end

     0   :  { %v995_v38 = vmov 0.0   ;;  %vm996_vm0 = vmmov 0   ;;  %vm464_vm1 = vcmask 130048   ;;  %s1230_s0 = inlined_call_operand.vmem [shape: bf16[13,784], index: 0, kind: input, shape index: {}]   ;;  %s1231_s1 = inlined_call_operand.vmem [shape: bf16[784,20], index: 1, kind: input, shape index: {}]   ;;  %s1232_s2 = inlined_call_operand.vmem [shape: f32[1,20], index: 2, kind: input, shape index: {}]   ;;  %s1233_s3 = inlined_call_operand.vmem [shape: bf16[20,10], index: 3, kind: input, shape index: {}]   ;;  %s1234_s4 = inlined_call_operand.vmem [shape: f32[1,10], index: 4, kind: input, shape index: {}]   ;;  %s1235_s5 = inlined_call_operand.hbm [shape: f32[13,10], index: 5, kind: output, shape index: {}]  }
   0x1   :  { %v898_v0 = vld [vmem:[%s1231_s1 + $0x40] sm:$0xff]   ;;  %v902_v4 = vld [vmem:[%s1231_s1 + $0x48] sm:$0xff]   ;;  %v906_v8 = vld [vmem:[%s1231_s1 + $0x50] sm:$0xff]  }
   0x2   :  { %v899_v1 = vld [vmem:[%s1231_s1] sm:$0xff]   ;;  %808 = vmatprep.subr.bf16.mxu0 %v898_v0  ;;  %v903_v5 = vld [vmem:[%s1231_s1 + $0x8] sm:$0xff]   ;;  %v907_v9 = vld [vmem:[%s1231_s1 + $0x10] sm:$0xff]  }
   0x3   :  { %v900_v2 = vld [vmem:[%s1231_s1 + $0xc0] sm:$0xff]   ;;  %809 = vmatpush3.bf16.msra.mxu0 %v899_v1  ;;  %v904_v6 = vld [vmem:[%s1231_s1 + $0xc8] sm:$0xff]   ;;  %v908_v10 = vld [vmem:[%s1231_s1 + $0xd0] sm:$0xff]  }
   0x4   :  { %v901_v3 = vld [vmem:[%s1231_s1 + $0x80] sm:$0xff]   ;;  %830 = vmatprep.subr.bf16.mxu1 %v900_v2  ;;  %810 = vmatprep.subr.bf16.mxu0 %v902_v4  ;;  %v905_v7 = vld [vmem:[%s1231_s1 + $0x88] sm:$0xff]   ;;  %v909_v11 = vld [vmem:[%s1231_s1 + $0x90] sm:$0xff]  }
   0x5   :  { %831 = vmatpush3.bf16.msra.mxu1 %v901_v3  ;;  %v910_v12 = vld [vmem:[%s1231_s1 + $0x58] sm:$0xff]   ;;  %v914_v16 = vld [vmem:[%s1231_s1 + $0x60] sm:$0xff]   ;;  %v918_v20 = vld [vmem:[%s1231_s1 + $0x68] sm:$0xff]  }
   0x6   :  { %832 = vmatprep.subr.bf16.mxu1 %v904_v6  ;;  %v911_v13 = vld [vmem:[%s1231_s1 + $0x18] sm:$0xff]   ;;  %v915_v17 = vld [vmem:[%s1231_s1 + $0x20] sm:$0xff]   ;;  %v919_v21 = vld [vmem:[%s1231_s1 + $0x28] sm:$0xff]  }
   0x7   :  { %811 = vmatpush3.bf16.msra.mxu0 %v903_v5  ;;  %v912_v14 = vld [vmem:[%s1231_s1 + $0xd8] sm:$0xff]   ;;  %v916_v18 = vld [vmem:[%s1231_s1 + $0xe0] sm:$0xff]   ;;  %v920_v22 = vld [vmem:[%s1231_s1 + $0xe8] sm:$0xff]  }
   0x8   :  { %812 = vmatprep.subr.bf16.mxu0 %v906_v8  ;;  %v913_v15 = vld [vmem:[%s1231_s1 + $0x98] sm:$0xff]   ;;  %v917_v19 = vld [vmem:[%s1231_s1 + $0xa0] sm:$0xff]   ;;  %v921_v23 = vld [vmem:[%s1231_s1 + $0xa8] sm:$0xff]  }
   0x9   :  { %833 = vmatpush3.bf16.msra.mxu1 %v905_v7  ;;  %v922_v24 = vld [vmem:[%s1231_s1 + $0x70] sm:$0xff]   ;;  %v926_v28 = vld [vmem:[%s1231_s1 + $0x78] sm:$0xff]   ;;  %v931_v32 = vld [vmem:[%s1230_s0 + $0x4] ss:$28 sps:$4 sm:$0xff]  }
   0xa   :  { %834 = vmatprep.subr.bf16.mxu1 %v908_v10  ;;  %v923_v25 = vld [vmem:[%s1231_s1 + $0x30] sm:$0xff]   ;;  %v927_v29 = vld [vmem:[%s1231_s1 + $0x38] sm:$0xff]   ;;  %500 = vmatprep.mubr.bf16.mxu0 %v931_v32  ;;  %v933_v34 = vld [vmem:[%s1231_s1 + $0x140] sm:$0xff]  }
   0xb   :  { %813 = vmatpush3.bf16.msra.mxu0 %v907_v9  ;;  %v924_v26 = vld [vmem:[%s1231_s1 + $0xf0] sm:$0xff]   ;;  %v928_v30 = vld [vmem:[%s1231_s1 + $0xf8] sm:$0xff]   ;;  %v934_v35 = vld [vmem:[%s1230_s0 + $0x8] ss:$28 sps:$4 sm:$0xff]  }
   0xc   :  { %814 = vmatprep.subr.bf16.mxu0 %v910_v12  ;;  %v925_v27 = vld [vmem:[%s1231_s1 + $0xb0] sm:$0xff]   ;;  %v929_v31 = vld [vmem:[%s1230_s0] ss:$28 sps:$4 sm:$0xff]   ;;  %v936_v36 = vld [vmem:[%s1230_s0 + $0xc] ss:$28 sps:$4 sm:$0xff]  }
   0xd   :  { %835 = vmatpush3.bf16.msra.mxu1 %v909_v11  ;;  %v932_v33 = vld [vmem:[%s1231_s1 + $0xb8] sm:$0xff]   ;;  %v937_v37 = vld [vmem:[%s1231_s1 + $0x100] sm:$0xff]   ;;  %541 = vmatprep.mubr.bf16.mxu1 %v936_v36  ;;  %v938_v39 = vld [vmem:[%s1231_s1 + $0x148] sm:$0xff]  }
   0xe   :  { %836 = vmatprep.subr.bf16.mxu1 %v912_v14  ;;  %v939_v40 = vld [vmem:[%s1231_s1 + $0x108] sm:$0xff]   ;;  %v940_v41 = vld [vmem:[%s1231_s1 + $0x150] sm:$0xff]   ;;  %v942_v43 = vld [vmem:[%s1231_s1 + $0x158] sm:$0xff]  }
   0xf   :  { %815 = vmatpush3.bf16.msra.mxu0 %v911_v13  ;;  %v941_v42 = vld [vmem:[%s1231_s1 + $0x110] sm:$0xff]   ;;  %v943_v44 = vld [vmem:[%s1231_s1 + $0x118] sm:$0xff]   ;;  %v944_v45 = vld [vmem:[%s1231_s1 + $0x160] sm:$0xff]  }
  0x10   :  { %816 = vmatprep.subr.bf16.mxu0 %v914_v16  ;;  %v945_v46 = vld [vmem:[%s1231_s1 + $0x120] sm:$0xff]   ;;  %v946_v47 = vld [vmem:[%s1231_s1 + $0x168] sm:$0xff]   ;;  %v955_v50 = vld [vmem:[%s1230_s0 + $0x14] ss:$28 sps:$4 sm:$0xff]  }
  0x11   :  { %837 = vmatpush3.bf16.msra.mxu1 %v913_v15  ;;  %v952_v48 = vld [vmem:[%s1231_s1 + $0x180] sm:$0xff]   ;;  %v947_v49 = vld [vmem:[%s1231_s1 + $0x128] sm:$0xff]   ;;  %v956_v51 = vld [vmem:[%s1230_s0 + $0x18] ss:$28 sps:$4 sm:$0xff]  }
  0x12   :  { %838 = vmatprep.subr.bf16.mxu1 %v916_v18  ;;  %v948_v52 = vld [vmem:[%s1231_s1 + $0x170] sm:$0xff]  }
  0x13   :  { %817 = vmatpush3.bf16.msra.mxu0 %v915_v17 }
  0x14   :  { %818 = vmatprep.subr.bf16.mxu0 %v918_v20 }
  0x15   :  { %839 = vmatpush3.bf16.msra.mxu1 %v917_v19 }
  0x16   :  { %840 = vmatprep.subr.bf16.mxu1 %v920_v22 }
  0x17   :  { %819 = vmatpush3.bf16.msra.mxu0 %v919_v21 }
  0x18   :  { %820 = vmatprep.subr.bf16.mxu0 %v922_v24 }
  0x19   :  { %841 = vmatpush3.bf16.msra.mxu1 %v921_v23 }
  0x1a   :  { %842 = vmatprep.subr.bf16.mxu1 %v924_v26 }
  0x1b   :  { %821 = vmatpush3.bf16.msra.mxu0 %v923_v25 }
  0x1c   :  { %822 = vmatprep.subr.bf16.mxu0 %v926_v28 }
  0x1d   :  { %843 = vmatpush3.bf16.msra.mxu1 %v925_v27 }
  0x1e   :  { %844 = vmatprep.subr.bf16.mxu1 %v928_v30 }
  0x1f   :  { %823 = vmatpush3.bf16.msra.mxu0 %v927_v29 }
  0x20   :  { %852 = vmatprep.subr.bf16.mxu0 %v933_v34 }
  0x21   :  { %845 = vmatpush3.bf16.msra.mxu1 %v932_v33 }
  0x22   :  { %501 = vmatmul.mubr.bf16.vlgmr.msra.gmra.mrb[0].mxu0 %v929_v31  ;;  %879 = vmatprep.subr.bf16.mxu1 %v995_v38 }
  0x23   :  { %853 = vmatpush3.bf16.msra.mxu0 %v937_v37  ;;  %582 = vmatprep.mubr.bf16.mxu0 %v955_v50 }
  0x24   :  { %542 = vmatmul.mubr.bf16.vlgmr.msra.gmra.mrb[0].mxu1 %v934_v35  ;;  %854 = vmatprep.subr.bf16.mxu0 %v938_v39 }
  0x25   :  { %881 = vmatprep.mubr.msk.bf16.mxu1 %vm996_vm0, %v995_v38  ;;  %880 = vmatpush3.bf16.msra.mxu1 %v952_v48 }
  0x26   :  { %885 = vmatprep.subr.bf16.mxu1 %v995_v38 }
  0x27   :  { %855 = vmatpush3.bf16.msra.mxu0 %v939_v40 }
  0x28   :  { %856 = vmatprep.subr.bf16.mxu0 %v940_v41 }
  0x2b   :  { %857 = vmatpush3.bf16.msra.mxu0 %v941_v42 }
  0x2c   :  { %858 = vmatprep.subr.bf16.mxu0 %v942_v43 }
  0x2f   :  { %859 = vmatpush3.bf16.msra.mxu0 %v943_v44 }
  0x30   :  { %860 = vmatprep.subr.bf16.mxu0 %v944_v45 }
  0x33   :  { %861 = vmatpush3.bf16.msra.mxu0 %v945_v46 }
  0x34   :  { %862 = vmatprep.subr.bf16.mxu0 %v946_v47 }
  0x35   :  { %10 = vsyncpa [#allocation3], 0  ;;  %882 = vmatmul.mubr.msk.bf16.vlgmr.msra.gmra.mrb[4].mxu1 %vm464_vm1, %v956_v51  ;;  %v949_v53 = vld [vmem:[%s1231_s1 + $0x130] sm:$0xff]   ;;  %v950_v54 = vld [vmem:[%s1231_s1 + $0x178] sm:$0xff]   ;;  %vm658_vm2 = vcmask 1041408   ;;  %vm654_vm3 = vcmask 162816  }
  0x36   :  { %889 = vmatprep.mubr.msk.bf16.mxu1 %vm996_vm0, %v995_v38  ;;  %v951_v55 = vld [vmem:[%s1231_s1 + $0x138] sm:$0xff]   ;;  %v953_v56 = vld [vmem:[%s1230_s0 + $0x10] ss:$28 sps:$4 sm:$0xff]   ;;  %v957_v57 = vld [vmem:[%s1233_s3] sm:$0xff]   ;;  %vm703_vm4 = vcmask 80896  }
  0x37   :  { %863 = vmatpush3.bf16.msra.mxu0 %v947_v49  ;;  %v958_v58 = vld [vmem:[%s1233_s3 + $0x8] ss:$0 sps:$4 sm:$0x33]   ;;  %886 = vmatpush3.bf16.msra.mxu1 %v957_v57  ;;  %v746_v61 = vld [vmem:[%s1232_s2] ss:$0 sm:$0xff]  ;;  %s997_s3 = smov [#allocation2]  }
  0x38   :  { %864 = vmatprep.subr.bf16.mxu0 %v948_v52  ;;  %887 = vmatprep.subr.bf16.mxu1 %v995_v38  ;;  %v660_v59 = vsel %vm658_vm2, %v958_v58, 0  ;;  %v804_v30 = vld [vmem:[%s1234_s4] ss:$0 sm:$0xff]  ;;  %s735_s4 = sshll.u32 %s997_s3, 4  ;;  %s736_s4 = int_to_ptr.vmem [resolvable:$true] %s735_s4 }
  0x39   :  { %s971_s10 = scalar_lea.vmem %s736_s4, 256  ;;  %p976_p1 = scmp.lt.s32.totalorder %s736_s4, %s736_s4 }
  0x3a   :  { %p972_p0 = scmp.ne.s32.totalorder %s736_s4, %s971_s10  ;;  %p977_p2 = scmp.lt.s32.totalorder %s971_s10, %s971_s10 }
  0x3b   :  { %865 = vmatpush3.bf16.msra.mxu0 %v949_v53  ;;  %888 = vmatpush3.bf16.msra.mxu1 %v660_v59 }
  0x3c   :  { %866 = vmatprep.subr.bf16.mxu0 %v950_v54  ;;  %p978_p3 = por %p977_p2, %p976_p1 }
  0x3e   :  { %p979_p4 = pnand %p978_p3, %p972_p0 }
  0x3f   :  { %867 = vmatpush3.bf16.msra.mxu0 %v951_v55 }
  0x42   :  { %583 = vmatmul.mubr.bf16.vlgmr.msra.gmra.mrb[4].mxu0 %v953_v56 }
  0xf5   :  { %v824_v60 = vpop.f32.mrb[0].mxu0 }
  0xf6   :  { %v825_v62 = vpop.f32.mrb[1].mxu0 }
  0xf7   :  { %v826_v63 = vadd.f32 %v825_v62, %v824_v60  ;;  %v827_v0 = vpop.f32.mrb[2].mxu0  ;;  %v846_v1 = vpop.f32.mrb[0].mxu1 }
  0xf8   :  { %v828_v2 = vpop.f32.mrb[3].mxu0  ;;  %v847_v5 = vpop.f32.mrb[1].mxu1 }
  0xf9   :  { %v503_v3 = vadd.f32 %v826_v63, %v746_v61  ;;  %v829_v4 = vadd.f32 %v828_v2, %v827_v0  ;;  %v848_v6 = vadd.f32 %v847_v5, %v846_v1  ;;  %v849_v7 = vpop.f32.mrb[2].mxu1 }
  0xfa   :  { %v850_v9 = vpop.f32.mrb[3].mxu1 }
  0xfb   :  { %v506_v8 = vadd.f32 %v829_v4, %v746_v61  ;;  %v544_v10 = vadd.f32 %v848_v6, %v503_v3  ;;  %v851_v11 = vadd.f32 %v850_v9, %v849_v7 }
  0xfd   :  { %v547_v12 = vadd.f32 %v851_v11, %v506_v8 }
 0x108   :  { %v625_v13 = vpop.f32.mrb[4].mxu1 }
 0x109   :  { %v883_v14 = vpop.f32.mrb[5].mxu1 }
 0x10a   :  { %v628_v15 = vpop.f32.mrb[6].mxu1 }
 0x10b   :  { %v884_v16 = vpop.f32.mrb[7].mxu1 }
 0x115   :  { %v868_v17 = vpop.f32.mrb[4].mxu0 }
 0x116   :  { %v869_v18 = vpop.f32.mrb[5].mxu0 }
 0x117   :  { %v870_v19 = vadd.f32 %v869_v18, %v868_v17  ;;  %v871_v20 = vpop.f32.mrb[6].mxu0 }
 0x118   :  { %v872_v21 = vpop.f32.mrb[7].mxu0 }
 0x119   :  { %v585_v22 = vadd.f32 %v870_v19, %v544_v10  ;;  %v873_v23 = vadd.f32 %v872_v21, %v871_v20 }
 0x11b   :  { %v626_v24 = vadd.f32 %v625_v13, %v585_v22  ;;  %v588_v25 = vadd.f32 %v873_v23, %v547_v12 }
 0x11d   :  { %v629_v26 = vadd.f32 %v628_v15, %v588_v25  ;;  %959 = vtanh.f32 %v626_v24 }
 0x11f   :  { %961 = vtanh.f32 %v629_v26 }
 0x127   :  { %v960_v27 = vpop.eup %959 }
 0x129   :  { %v962_v28 = vpop.eup %961 }
 0x12a   :  { %v634_v29 = vpack.c.bf16 %v962_v28, %v960_v27 }
 0x12c   :  { %890 = vmatmul.mubr.msk.bf16.vlgmr.msra.gmra.mrb[8].mxu1 %vm654_vm3, %v634_v29 }
 0x1ff   :  { %v696_v31 = vpop.f32.mrb[8].mxu1 }
 0x200   :  { %v697_v32 = vadd.f32 %v804_v30, %v696_v31  ;;  %v891_v33 = vpop.f32.mrb[9].mxu1 }
 0x201   :  { %v699_v34 = vpop.f32.mrb[10].mxu1 }
 0x202   :  { %v700_v35 = vadd.f32 %v804_v30, %v699_v34  ;;  %v892_v36 = vpop.f32.mrb[11].mxu1  ;;  %v704_v37 = vsel %vm703_vm4, %v697_v32, -inf }
 0x203   :  { %705 = vmax.xlane.f32.xlu0 %v704_v37 }
 0x204   :  { %v707_v38 = vsel %vm703_vm4, %v700_v35, -inf }
 0x207   :  { %708 = vmax.xlane.f32.xlu0 %v707_v38 }
 0x290   :  { %v706_v39 = vpop.xlane.xlu0 %705 }
 0x291   :  { %v710_v40 = vsub.f32 %v697_v32, %v706_v39 }
 0x293   :  { %v712_v41 = vmul.f32 1.442695, %v710_v40 }
 0x294   :  { %v709_v42 = vpop.xlane.xlu0 %708 }
 0x295   :  { %963 = vpow2.f32 %v712_v41  ;;  %v711_v43 = vsub.f32 %v700_v35, %v709_v42 }
 0x297   :  { %v714_v44 = vmul.f32 1.442695, %v711_v43 }
 0x299   :  { %965 = vpow2.f32 %v714_v44 }
 0x29f   :  { %v964_v45 = vpop.eup %963 }
 0x2a0   :  { %v716_v46 = vsel %vm703_vm4, %v964_v45, 0.0 }
 0x2a1   :  { %717 = vadd.xlane.f32.xlu1 %v716_v46 }
 0x2a3   :  { %v966_v47 = vpop.eup %965 }
 0x2a4   :  { %v719_v48 = vsel %vm703_vm4, %v966_v47, 0.0 }
 0x2a5   :  { %720 = vadd.xlane.f32.xlu1 %v719_v48 }
 0x32e   :  { %v718_v49 = vpop.xlane.xlu1 %717 }
 0x32f   :  { %967 = vlog2.f32 %v718_v49 }
 0x332   :  { %v721_v50 = vpop.xlane.xlu1 %720 }
 0x333   :  { %969 = vlog2.f32 %v721_v50 }
 0x339   :  { %v968_v51 = vpop.eup %967 }
 0x33a   :  { %v723_v52 = vmul.f32 0.6931472, %v968_v51 }
 0x33c   :  { %v726_v53 = vsub.f32 %v710_v40, %v723_v52 }
 0x33d   :  { %v970_v54 = vpop.eup %969 }
 0x33e   :  { %728 = vst.msk [vmem:[#allocation2] sm:$0xff] %vm703_vm4, %v726_v53  ;;  %v725_v55 = vmul.f32 0.6931472, %v970_v54 }
 0x340   :  { %v727_v56 = vsub.f32 %v711_v43, %v725_v55 }
 0x342   :  { %729 = vst.msk [vmem:[#allocation2 + $0x8] sm:$0xff] %vm703_vm4, %v727_v56 }
 0x343   :  { %982 = shalt.err (!%p979_p4)
}
 0x344   :  { %s983_s13 = scalar_lea.hbm %s1235_s5, 256 }
 0x345   :  { %p984_p5 = scmp.ne.s32.totalorder %s1235_s5, %s983_s13  ;;  %p987_p6 = scmp.lt.u32.totalorder %s983_s13, %s1235_s5 }
 0x347   :  { %p989_p7 = pnand %p987_p6, %p984_p5 }
 0x349   :  { %992 = shalt.err (!%p989_p7)
}
 0x34a   :  { %s998_s18 = smov 128   ;;  %s999_s19 = smov 8  }
 0x34b   :  { %741 = dma.vmem_to_hbm [thread:$0]  %s736_s4, 256, %s1235_s5, [#allocation3], %s998_s18, %s998_s18, %s999_s19  }
 0x34c   :  { %993 = dma.done.wait [#allocation3], 256  }
 0x34d   :  { %994 = vsyncadd [#allocation3], 4294967040 }
 0x34e   :  { %745 = vsyncpa [#allocation3], 1 }

</bundles_post_ra>
